<compile_context>
chip_gen: v7x
topology: tpu7x:2x2x1
jax: 0.10.0
libtpu: 0.0.40
codegen_flags: <defaults>
</compile_context>

<pallas_src>
import functools

import numpy as np
import jax
import jax.numpy as jnp
from jax import lax
from jax.experimental import pallas as pl
from jax.experimental.pallas import tpu as pltpu


# ----------------------------------------------------------------------------
# Host-side helpers (parameters, BN folding, interpolation matrices)
# ----------------------------------------------------------------------------

def _bilinear_matrix_align_corners(n_in: int, n_out: int) -> np.ndarray:
    """Interpolation matrix M (n_out, n_in): out = M @ in.

    Matches PyTorch bilinear upsampling with align_corners=True.
    """
    M = np.zeros((n_out, n_in), dtype=np.float32)
    if n_in == 1:
        M[:, 0] = 1.0
        return M
    scale = (n_in - 1) / (n_out - 1)
    for i in range(n_out):
        src = i * scale
        i0 = min(int(np.floor(src)), n_in - 1)
        i1 = min(i0 + 1, n_in - 1)
        f = src - i0
        M[i, i0] += 1.0 - f
        M[i, i1] += f
    return M


def _fold_bn(w_hwio, b, gamma, beta, mean, var, eps=1e-5):
    """Fold inference BatchNorm into the preceding conv (HWIO weights)."""
    s = gamma / jnp.sqrt(var + eps)
    return w_hwio * s, (b - mean) * s + beta


def _conv_bn_params(key, kh, kw, cin, cout):
    ks = jax.random.split(key, 6)
    w = 0.3 * jax.random.normal(ks[0], (kh, kw, cin, cout), jnp.float32)
    b = 0.1 * jax.random.normal(ks[1], (cout,), jnp.float32)
    gamma = 1.0 + 0.2 * jax.random.normal(ks[2], (cout,), jnp.float32)
    beta = 0.1 * jax.random.normal(ks[3], (cout,), jnp.float32)
    mean = 0.1 * jax.random.normal(ks[4], (cout,), jnp.float32)
    var = 0.5 + jax.random.uniform(ks[5], (cout,), jnp.float32)
    return _fold_bn(w, b, gamma, beta, mean, var)


def make_up_params(key, in_ch1, in_ch2, out_ch):
    """Deterministic folded parameters for Up(in_ch1, out_ch, in_ch2, attn=False)."""
    cin = in_ch1 + in_ch2
    k1, k2, k3 = jax.random.split(key, 3)
    w1, b1 = _conv_bn_params(k1, 3, 3, cin, out_ch)     # double_conv: conv1+BN1
    w2, b2 = _conv_bn_params(k2, 3, 3, out_ch, out_ch)  # double_conv: conv2+BN2
    wi, bi = _conv_bn_params(k3, 1, 1, cin, out_ch)     # identity conv1x1+BN
    return dict(w1=w1, b1=b1, w2=w2, b2=b2, wi=wi, bi=bi)


# ----------------------------------------------------------------------------
# Kernel 1: bilinear 2x upsample (align_corners=True)
# ----------------------------------------------------------------------------

def _upsample2x_kernel(x_ref, wy_ref, wx_ref, o_ref):
    # x_ref : (1, H, W, C)   one NHWC image
    # wy_ref: (2H, H)        row interpolation matrix
    # wx_ref: (2W, W)        column interpolation matrix (W-only contraction)
    # o_ref : (1, 2H, 2W*C)  lane-dense output
    H, W, C = x_ref.shape[1], x_ref.shape[2], x_ref.shape[3]
    Ho, Wo = wy_ref.shape[0], wx_ref.shape[0]
    cdt = wy_ref.dtype

    x = x_ref[0].astype(cdt)                                      # (H, W, C)

    # Column interpolation: batched over input rows, contracting over W only
    # (weight is (2W, W); no kron with the channel identity).
    wxb = jnp.broadcast_to(wx_ref[...][None, :, :], (H, Wo, W))   # hoisted once
    t = lax.dot_general(wxb, x, (((2,), (1,)), ((0,), (0,))),
                        preferred_element_type=jnp.float32)       # (H, Wo, C)

    # Row interpolation: one dense MXU matmul on the lane-flattened layout.
    t2 = t.reshape(H, Wo * C).astype(cdt)
    o = jnp.dot(wy_ref[...], t2, preferred_element_type=jnp.float32)
    o_ref[0] = o.astype(o_ref.dtype)


def bilinear_upsample_2x(x_nhwc, compute_dtype=jnp.float32):
    """nn.Upsample(scale_factor=2, mode='bilinear', align_corners=True), NHWC."""
    B, H, W, C = x_nhwc.shape
    Ho, Wo = 2 * H, 2 * W
    wy = jnp.asarray(_bilinear_matrix_align_corners(H, Ho)).astype(compute_dtype)
    wx = jnp.asarray(_bilinear_matrix_align_corners(W, Wo)).astype(compute_dtype)

    flops = 2 * B * (H * Wo * W * C + Ho * H * Wo * C)
    bytes_accessed = 4 * B * (H * W * C + Ho * Wo * C) + 4 * (Ho * H + Wo * W)

    out2d = pl.pallas_call(
        _upsample2x_kernel,
        out_shape=jax.ShapeDtypeStruct((B, Ho, Wo * C), x_nhwc.dtype),
        grid=(B,),
        in_specs=[
            pl.BlockSpec((1, H, W, C), lambda b: (b, 0, 0, 0)),
            pl.BlockSpec((Ho, H), lambda b: (0, 0)),
            pl.BlockSpec((Wo, W), lambda b: (0, 0)),
        ],
        out_specs=pl.BlockSpec((1, Ho, Wo * C), lambda b: (b, 0, 0)),
        compiler_params=pltpu.CompilerParams(dimension_semantics=("parallel",)),
        cost_estimate=pl.CostEstimate(flops=flops, transcendentals=0,
                                      bytes_accessed=bytes_accessed),
    )(x_nhwc, wy, wx)
    return out2d.reshape(B, Ho, Wo, C)


# ----------------------------------------------------------------------------
# Kernel 2: fused DoubleConv (conv3x3+BN+ReLU -> conv3x3+BN, + conv1x1+BN, ReLU)
# ----------------------------------------------------------------------------

def _doubleconv_kernel(x2_ref, up_ref, w1a_ref, w1b_ref, b1_ref,
                       w2_ref, b2_ref, wia_ref, wib_ref, bi_ref,
                       o_ref, mid_ref, *, TH, W):
    """One (batch, row-tile) grid cell of the fused DoubleConv.

    x2_ref : (1, TH+4, W+2, C2)  row window of x2, padded by (2 rows, 1 col)
    up_ref : (1, TH+4, W+2, C1)  same window of the upsampled x1
    w1a/w1b: (9, C2, Cm)/(9, C1, Cm)  conv1 3x3 weights split by channel half
    b1     : (1, Cm)
    w2     : (9, Cm, Co), b2: (1, Co)  conv2 3x3 (+ folded BN)
    wia/wib: (C2, Co)/(C1, Co), bi: (1, Co)  identity conv1x1 (+ folded BN)
    o_ref  : (1, TH, W*Co)   lane-dense output tile = ReLU(conv2 + identity)
    mid_ref: VMEM (TH+2, W+2, Cm) f32  conv1 rows (tile + 1-row halo) w/ 0 ring
    """
    C2 = x2_ref.shape[3]
    C1 = up_ref.shape[3]
    Cm = b1_ref.shape[1]
    Co = bi_ref.shape[1]
    NR = TH + 2
    cdt = w1a_ref.dtype
    r = pl.program_id(1)

    # ---- conv1 (3x3 + folded BN, ReLU) for TH + 2 rows in one batched pass.
    # "9 shifted slabs, accumulate": no per-row im2col / concatenate.
    acc1 = jnp.zeros((NR * W, Cm), jnp.float32)
    for k in range(9):
        dy, dx = k // 3, k % 3
        sa = x2_ref[0, dy:dy + NR, dx:dx + W, :].reshape(NR * W, C2).astype(cdt)
        sb = up_ref[0, dy:dy + NR, dx:dx + W, :].reshape(NR * W, C1).astype(cdt)
        acc1 = acc1 + jnp.dot(sa, w1a_ref[k], preferred_element_type=jnp.float32)
        acc1 = acc1 + jnp.dot(sb, w1b_ref[k], preferred_element_type=jnp.float32)
    mid = jnp.maximum(acc1 + b1_ref[...].astype(jnp.float32), 0.0)

    # Zero only the halo ring of the scratch (conv2's zero padding), then store
    # the conv1 rows.
    mid_ref[:, 0:1, :] = jnp.zeros((NR, 1, Cm), mid_ref.dtype)
    mid_ref[:, W + 1:W + 2, :] = jnp.zeros((NR, 1, Cm), mid_ref.dtype)
    mid_ref[:, 1:W + 1, :] = mid.reshape(NR, W, Cm)

    # Halo rows that fall outside the image must be zero (conv2 zero padding).
    @pl.when(r == 0)
    def _():
        mid_ref[0:1, :, :] = jnp.zeros((1, W + 2, Cm), mid_ref.dtype)

    @pl.when(r == pl.num_programs(1) - 1)
    def _():
        mid_ref[NR - 1:NR, :, :] = jnp.zeros((1, W + 2, Cm), mid_ref.dtype)

    # ---- conv2 (3x3 + BN) + identity conv1x1 (+ BN), residual ReLU ----
    acc2 = jnp.zeros((TH * W, Co), jnp.float32)
    for k in range(9):
        dy, dx = k // 3, k % 3
        sm = mid_ref[dy:dy + TH, dx:dx + W, :].reshape(TH * W, Cm).astype(cdt)
        acc2 = acc2 + jnp.dot(sm, w2_ref[k], preferred_element_type=jnp.float32)

    xa = x2_ref[0, 2:2 + TH, 1:W + 1, :].reshape(TH * W, C2).astype(cdt)
    xb = up_ref[0, 2:2 + TH, 1:W + 1, :].reshape(TH * W, C1).astype(cdt)
    acc2 = acc2 + jnp.dot(xa, wia_ref[...], preferred_element_type=jnp.float32)
    acc2 = acc2 + jnp.dot(xb, wib_ref[...], preferred_element_type=jnp.float32)
    acc2 = acc2 + b2_ref[...].astype(jnp.float32) + bi_ref[...].astype(jnp.float32)

    out = jnp.maximum(acc2, 0.0)
    o_ref[0] = out.reshape(TH, W * Co).astype(o_ref.dtype)


def _pick_row_tile(H, target):
    # Row tile must be a multiple of 8 (sublane tiling of the output block) and
    # divide H; otherwise fall back to the whole image (avoids the prime-H
    # "decrement to 1" cliff).
    cands = [t for t in range(8, H + 1, 8) if H % t == 0]
    if not cands:
        return H
    fitting = [t for t in cands if t <= target]
    return max(fitting) if fitting else min(cands)


def double_conv_pallas(x2_nhwc, up_nhwc, params, row_tile=8,
                       compute_dtype=jnp.float32):
    """DoubleConv(cat([x2, up], channel)) without materializing the concat."""
    B, H, W, C2 = x2_nhwc.shape
    C1 = up_nhwc.shape[3]
    Cm = params["w1"].shape[-1]
    Co = params["w2"].shape[-1]
    Cin = C2 + C1
    assert params["w1"].shape[2] == Cin and params["wi"].shape[2] == Cin

    TH = _pick_row_tile(H, row_tile)
    R = H // TH

    # 2-row / 1-col zero border: every row tile then loads a fixed (TH+4)-row
    # window via pl.Element offsets that always stay in bounds.
    x2p = jnp.pad(x2_nhwc, ((0, 0), (2, 2), (1, 1), (0, 0)))
    upp = jnp.pad(up_nhwc, ((0, 0), (2, 2), (1, 1), (0, 0)))

    cdt = compute_dtype
    w1a = params["w1"][:, :, :C2, :].reshape(9, C2, Cm).astype(cdt)
    w1b = params["w1"][:, :, C2:, :].reshape(9, C1, Cm).astype(cdt)
    b1 = params["b1"].reshape(1, Cm).astype(jnp.float32)
    w2 = params["w2"].reshape(9, Cm, Co).astype(cdt)
    b2 = params["b2"].reshape(1, Co).astype(jnp.float32)
    wia = params["wi"][0, 0, :C2, :].astype(cdt)
    wib = params["wi"][0, 0, C2:, :].astype(cdt)
    bi = params["bi"].reshape(1, Co).astype(jnp.float32)

    flops = 2 * B * H * W * (9 * Cin * Cm + 9 * Cm * Co + Cin * Co)
    bytes_accessed = (4 * (x2p.size + upp.size + B * H * W * Co)
                      + 4 * (w1a.size + w1b.size + w2.size + wia.size + wib.size))

    kernel = functools.partial(_doubleconv_kernel, TH=TH, W=W)

    out2d = pl.pallas_call(
        kernel,
        out_shape=jax.ShapeDtypeStruct((B, H, W * Co), x2_nhwc.dtype),
        grid=(B, R),
        in_specs=[
            pl.BlockSpec((1, pl.Element(TH + 4), W + 2, C2),
                         lambda b, r: (b, r * TH, 0, 0)),
            pl.BlockSpec((1, pl.Element(TH + 4), W + 2, C1),
                         lambda b, r: (b, r * TH, 0, 0)),
            pl.BlockSpec((9, C2, Cm), lambda b, r: (0, 0, 0)),
            pl.BlockSpec((9, C1, Cm), lambda b, r: (0, 0, 0)),
            pl.BlockSpec((1, Cm), lambda b, r: (0, 0)),
            pl.BlockSpec((9, Cm, Co), lambda b, r: (0, 0, 0)),
            pl.BlockSpec((1, Co), lambda b, r: (0, 0)),
            pl.BlockSpec((C2, Co), lambda b, r: (0, 0)),
            pl.BlockSpec((C1, Co), lambda b, r: (0, 0)),
            pl.BlockSpec((1, Co), lambda b, r: (0, 0)),
        ],
        out_specs=pl.BlockSpec((1, TH, W * Co), lambda b, r: (b, r, 0)),
        scratch_shapes=[pltpu.VMEM((TH + 2, W + 2, Cm), jnp.float32)],
        compiler_params=pltpu.CompilerParams(
            dimension_semantics=("parallel", "parallel")),
        cost_estimate=pl.CostEstimate(flops=flops, transcendentals=0,
                                      bytes_accessed=bytes_accessed),
    )(x2p, upp, w1a, w1b, b1, w2, b2, wia, wib, bi)
    return out2d.reshape(B, H, W, Co)


# ----------------------------------------------------------------------------
# Full Up.forward (Pallas) and a pure-JAX reference
# ----------------------------------------------------------------------------

def up_forward_pallas(x1_nchw, x2_nchw, params, row_tile=8,
                      compute_dtype=jnp.float32):
    """Up.forward(x1, x2) with attn=False. NCHW in, NCHW out."""
    x1 = jnp.transpose(x1_nchw, (0, 2, 3, 1))
    x2 = jnp.transpose(x2_nchw, (0, 2, 3, 1))

    up = bilinear_upsample_2x(x1, compute_dtype=compute_dtype)   # (B, 2H1, 2W1, C1)

    dY = x2.shape[1] - up.shape[1]
    dX = x2.shape[2] - up.shape[2]
    assert dY >= 0 and dX >= 0, "negative pad (crop) is not supported"
    if dY or dX:
        up = jnp.pad(up, ((0, 0), (dY // 2, dY - dY // 2),
                          (dX // 2, dX - dX // 2), (0, 0)))

    # torch.cat([x2, x1], dim=1) is folded into the DoubleConv kernel by
    # splitting conv1 / identity weights along the input-channel axis.
    out = double_conv_pallas(x2, up, params, row_tile=row_tile,
                             compute_dtype=compute_dtype)
    return jnp.transpose(out, (0, 3, 1, 2))


def up_forward_ref(x1_nchw, x2_nchw, params):
    """Pure-JAX reference mirroring the PyTorch forward (no Pallas)."""
    x1 = jnp.transpose(x1_nchw, (0, 2, 3, 1))
    x2 = jnp.transpose(x2_nchw, (0, 2, 3, 1))
    B, H, W, C = x1.shape
    wy = jnp.asarray(_bilinear_matrix_align_corners(H, 2 * H))
    wx = jnp.asarray(_bilinear_matrix_align_corners(W, 2 * W))
    up = jnp.einsum("im,bmwc->biwc", wy, x1, precision=lax.Precision.HIGHEST)
    up = jnp.einsum("jn,binc->bijc", wx, up, precision=lax.Precision.HIGHEST)

    dY = x2.shape[1] - up.shape[1]
    dX = x2.shape[2] - up.shape[2]
    if dY or dX:
        up = jnp.pad(up, ((0, 0), (dY // 2, dY - dY // 2),
                          (dX // 2, dX - dX // 2), (0, 0)))
    cat = jnp.concatenate([x2, up], axis=-1)

    def conv(x, w, b, pad):
        y = lax.conv_general_dilated(x, w, (1, 1), pad,
                                     dimension_numbers=("NHWC", "HWIO", "NHWC"),
                                     precision=lax.Precision.HIGHEST)
        return y + b

    h1 = jax.nn.relu(conv(cat, params["w1"], params["b1"], [(1, 1), (1, 1)]))
    h2 = conv(h1, params["w2"], params["b2"], [(1, 1), (1, 1)])
    idt = conv(cat, params["wi"], params["bi"], [(0, 0), (0, 0)])
    out = jax.nn.relu(h2 + idt)
    return jnp.transpose(out, (0, 3, 1, 2))


if __name__ == "__main__":
    B, in_ch1, in_ch2, out_ch = 2, 4, 4, 8
    H1 = W1 = 8                 # x1 spatial; upsampled to 16x16
    H2 = W2 = 16                # x2 spatial

    key = jax.random.PRNGKey(0)
    kx1, kx2, kp = jax.random.split(key, 3)
    x1 = jax.random.normal(kx1, (B, in_ch1, H1, W1), jnp.float32)
    x2 = jax.random.normal(kx2, (B, in_ch2, H2, W2), jnp.float32)
    params = make_up_params(kp, in_ch1, in_ch2, out_ch)

    out = jax.block_until_ready(up_forward_pallas(x1, x2, params, row_tile=8))
    ref = jax.block_until_ready(up_forward_ref(x1, x2, params))

    np.testing.assert_allclose(np.asarray(out), np.asarray(ref),
                               rtol=2e-3, atol=2e-3)
    assert out.shape == (B, out_ch, H2, W2) and out.dtype == x1.dtype
    print("KERNEL_OK")
</pallas_src>

<mosaic_0001>
module attributes {stable_mosaic.version = 11 : i64} {
  func.func @_upsample2x_kernel(%arg0: i32, %arg1: memref<1x8x8x4xf32, #tpu.memory_space<vmem>>, %arg2: memref<16x8xf32, #tpu.memory_space<vmem>>, %arg3: memref<16x8xf32, #tpu.memory_space<vmem>>, %arg4: memref<1x16x64xf32, #tpu.memory_space<vmem>>) attributes {dimension_semantics = [#tpu.dimension_semantics<parallel>], iteration_bounds = array<i64: 2>, scalar_prefetch = 0 : i64, scratch_operands = 0 : i64, tpu.core_type = #tpu.core_type<tc>, window_params = [{transform_indices = @transform_0, window_bounds = array<i64: 1, 8, 8, 4>}, {pipeline_mode = #tpu.pipeline_mode<synchronous>, transform_indices = @transform_1, window_bounds = array<i64: 16, 8>}, {pipeline_mode = #tpu.pipeline_mode<synchronous>, transform_indices = @transform_2, window_bounds = array<i64: 16, 8>}, {transform_indices = @transform_3, window_bounds = array<i64: 1, 16, 64>}]} {
    %c0 = arith.constant 0 : index
    %c0_0 = arith.constant 0 : index
    %c0_1 = arith.constant 0 : index
    %c0_2 = arith.constant 0 : index
    %0 = vector.load %arg1[%c0, %c0_0, %c0_1, %c0_2] : memref<1x8x8x4xf32, #tpu.memory_space<vmem>>, vector<1x8x8x4xf32>
    %1 = vector.shape_cast %0 : vector<1x8x8x4xf32> to vector<8x8x4xf32>
    %c0_3 = arith.constant 0 : index
    %c0_4 = arith.constant 0 : index
    %2 = vector.load %arg3[%c0_3, %c0_4] : memref<16x8xf32, #tpu.memory_space<vmem>>, vector<16x8xf32>
    %3 = vector.shape_cast %2 : vector<16x8xf32> to vector<1x16x8xf32>
    %4 = vector.shape_cast %3 : vector<1x16x8xf32> to vector<1x16x8xf32>
    %5 = vector.broadcast %4 : vector<1x16x8xf32> to vector<8x16x8xf32>
    %cst = arith.constant dense<0.000000e+00> : vector<8x16x4xf32>
    %6 = tpu.matmul %5, %1, %cst {dimension_numbers = #tpu.dot_dimension_numbers<[2], [1], [1], [2], [0, 0, 0, 1, 1, 2], [0], [0]>} : vector<8x16x8xf32>, vector<8x8x4xf32>, vector<8x16x4xf32> -> vector<8x16x4xf32>
    %7 = vector.shape_cast %6 : vector<8x16x4xf32> to vector<8x64xf32>
    %c0_5 = arith.constant 0 : index
    %c0_6 = arith.constant 0 : index
    %8 = vector.load %arg2[%c0_5, %c0_6] : memref<16x8xf32, #tpu.memory_space<vmem>>, vector<16x8xf32>
    %cst_7 = arith.constant dense<0.000000e+00> : vector<16x64xf32>
    %9 = tpu.matmul %8, %7, %cst_7 {dimension_numbers = #tpu.dot_dimension_numbers<[1], [0], [0], [1], [0, 0, 1, 1], [], []>} : vector<16x8xf32>, vector<8x64xf32>, vector<16x64xf32> -> vector<16x64xf32>
    %c0_8 = arith.constant 0 : index
    %c0_9 = arith.constant 0 : index
    %c0_10 = arith.constant 0 : index
    %10 = vector.load %arg4[%c0_8, %c0_9, %c0_10] : memref<1x16x64xf32, #tpu.memory_space<vmem>>, vector<1x16x64xf32>
    %11 = vector.shape_cast %10 : vector<1x16x64xf32> to vector<16x64xf32>
    %12 = vector.shape_cast %9 : vector<16x64xf32> to vector<1x16x64xf32>
    tpu.vector_store %arg4[%c0_8, %c0_9, %c0_10], %12 {strides = array<i32>} : memref<1x16x64xf32, #tpu.memory_space<vmem>>, vector<1x16x64xf32>,
    return
  }
  func.func @transform_0(%arg0: i32) -> (i32, i32, i32, i32) {
    %c0_i32 = arith.constant 0 : i32
    %c0_i32_0 = arith.constant 0 : i32
    %c0_i32_1 = arith.constant 0 : i32
    %c0_i32_2 = arith.constant 0 : i32
    return %arg0, %c0_i32, %c0_i32_0, %c0_i32_1 : i32, i32, i32, i32
  }
  func.func @transform_1(%arg0: i32) -> (i32, i32) {
    %c0_i32 = arith.constant 0 : i32
    %c0_i32_0 = arith.constant 0 : i32
    %c0_i32_1 = arith.constant 0 : i32
    return %c0_i32, %c0_i32_0 : i32, i32
  }
  func.func @transform_2(%arg0: i32) -> (i32, i32) {
    %c0_i32 = arith.constant 0 : i32
    %c0_i32_0 = arith.constant 0 : i32
    %c0_i32_1 = arith.constant 0 : i32
    return %c0_i32, %c0_i32_0 : i32, i32
  }
  func.func @transform_3(%arg0: i32) -> (i32, i32, i32) {
    %c0_i32 = arith.constant 0 : i32
    %c0_i32_0 = arith.constant 0 : i32
    %c0_i32_1 = arith.constant 0 : i32
    return %arg0, %c0_i32, %c0_i32_0 : i32, i32, i32
  }
}

</mosaic_0001>

<bundles_post_ra>
// kernel: tpu_custom_call.1
= control target key start
LH: loop header
LB: loop body
LE: loop exit
PB: predicated region body
PF: predicated region fallthrough
CT: control target
= control target key end

     0   :  { %8 = vsyncpa [#allocation3], 0  ;;  %s1755_s0 = inlined_call_operand.vmem [shape: f32[2,8,8,4], index: 0, kind: input, shape index: {}]   ;;  %s1756_s1 = inlined_call_operand.vmem [shape: f32[16,8], index: 1, kind: input, shape index: {}]   ;;  %s1757_s2 = inlined_call_operand.vmem [shape: f32[16,8], index: 2, kind: input, shape index: {}]   ;;  %s1758_s3 = inlined_call_operand.hbm [shape: f32[2,16,64], index: 3, kind: output, shape index: {}]  }
   0x1   :  { %10 = vsyncpa [#allocation3 + $0x1], 0  ;;  %s1573_s12 = smov 0   ;;  %s1575_s13 = smov 0  }
   0x2   :  { %s1577_s14 = smov 0   ;;  %s1579_s15 = smov 0  }
   0x3 LB: > { %s1594_s16 = sadd.s32 4294967295, %s1532_s15   ;;  %s1309_s17 = sadd.s32 4294967294, %s1532_s15   ;;  %s1532_s15 = sphi %s1579_s15, %s1764_s15   ;;  %s1528_s14 = sphi %s1577_s14, %s1763_s14   ;;  %s1524_s13 = sphi %s1575_s13, %s1762_s13   ;;  %s1520_s12 = sphi %s1573_s12, %s1761_s12  }
   0x4   : > { %s1598_s18 = sadd.s32 1, %s1532_s15   ;;  %s91_s19 = sadd.s32 1, %s1528_s14 }
   0x5   : > { %s88_s20 = ssub.s32 %s1532_s15, %s1598_s18  ;;  %p101_p0 = scmp.ne.s32.totalorder %s1528_s14, %s1524_s13 }
   0x6   : > { %p89_p1 = scmp.eq.s32.totalorder %s88_s20, 0  ;;  %p102_p2 = scmp.eq.s32.totalorder %s1594_s16, 1 }
   0x7   : > { %p107_p3 = scmp.ne.s32.totalorder %s1524_s13, %s1520_s12  ;;  %p108_p4 = scmp.eq.s32.totalorder %s1309_s17, 1 }
   0x8   : > { %s1609_s21 = scalar_select %p89_p1, %s1528_s14, %s91_s19  }
   0x9   : > { %p1611_p5 = por %p102_p2, %p101_p0  ;;  %p1615_p6 = por %p108_p4, %p107_p3 }
   0xa   : > { %p1312_p7 = scmp.ge.s32.totalorder %s1532_s15, 1  ;;  %p140_p8 = scmp.lt.s32.totalorder %s1532_s15, 3 }
   0xc   : > { %p141_p9 = pnand %p1312_p7, %p140_p8 }
   0xd   : > { %p164_p10 = scmp.lt.s32.totalorder (!%p141_p9), %s1594_s16, 1  ;;  %v177_v0 = vld [vmem:[%s1757_s2] sm:$0xff] (!%p141_p9)  ;;  %vm179_vm0 = vcmask (!%p141_p9), 64512   ;;  %v178_v3 = vld [vmem:[%s1757_s2 + $0x8] sm:$0xff] (!%p141_p9)  ;;  %v1534_v10 = vmov (!%p141_p9), 1983009808   ;;  %v791_v12 = vlaneseq (!%p141_p9) }
   0xe   : > { %144 = sbr.rel (%p141_p9) target bundleno = 636 (0x27c), region = 32  ;;  %1370 = vmatprep.mubr.msk.f32.mxu0 (!%p141_p9), %vm179_vm0, %v177_v0  ;;  %1375 = vmatprep.mubr.msk.f32.mxu1 (!%p141_p9), %vm179_vm0, %v177_v0  ;;  %v789_v11 = vunpack.c.l.s4 (!%p141_p9), %v1534_v10  ;;  %v1535_v13 = vmov (!%p141_p9), 1934713408   ;;  %s1536_s6 = smov (!%p141_p9), 36   ;;  %vm1118_vm1 = vcmask (!%p141_p9), 31744   ;;  %vm1121_vm2 = vcmask (!%p141_p9), 97280  }
   0xf   : > { %v853_v14 = vunpack.c.l.s4 (!%p141_p9), %v1535_v13  ;;  %v792_v16 = vshrl.u32 (!%p141_p9), %v791_v12, 7  ;;  %s1537_s7 = smov (!%p141_p9), 32   ;;  %s1538_s8 = smov (!%p141_p9), 44   ;;  %vm1123_vm3 = vcmask (!%p141_p9), 130048   ;;  %vm1125_vm4 = vcmask (!%p141_p9), 162816  }
  0x10   : > { %v790_v15 = vunpack.c.0.s8 (!%p141_p9), %v789_v11  ;;  %s1539_s9 = smov (!%p141_p9), 40   ;;  %s1540_s10 = smov (!%p141_p9), 12   ;;  %vm1127_vm5 = vcmask (!%p141_p9), 195584   ;;  %vm1129_vm6 = vcmask (!%p141_p9), 228352   ;;  %vm1131_vm7 = vcmask (!%p141_p9), 261120  }
  0x11   : > { %v854_v19 = vunpack.c.0.s8 (!%p141_p9), %v853_v14  ;;  %s1541_s11 = smov (!%p141_p9), 4   ;;  %s1542_s17 = smov (!%p141_p9), 16   ;;  %vm1133_vm8 = vcmask (!%p141_p9), 293888   ;;  %vm1135_vm9 = vcmask (!%p141_p9), 326656   ;;  %vm1137_vm10 = vcmask (!%p141_p9), 359424  }
  0x12   : > { %v793_v22 = vsub.s32 (!%p141_p9), %v790_v15, %v792_v16  ;;  %s1543_s19 = smov (!%p141_p9), 8   ;;  %s1544_s20 = smov (!%p141_p9), 24   ;;  %vm1139_vm11 = vcmask (!%p141_p9), 392192   ;;  %vm1141_vm12 = vcmask (!%p141_p9), 424960   ;;  %vm1143_vm13 = vcmask (!%p141_p9), 457728  }
  0x13   : > { %v1648_v25 = vsub.s32 (!%p141_p9), %v854_v19, %v792_v16  ;;  %s1545_s24 = smov (!%p141_p9), 20   ;;  %s1547_s28 = smov (!%p141_p9), 28   ;;  %vm1145_vm14 = vcmask (!%p141_p9), 490496   ;;  %vm1230_vm15 = vcmask (!%p141_p9), 523264  }
  0x14   : > { %s1548_s29 = smov (!%p141_p9), 56   ;;  %s1550_s4 = smov (!%p141_p9), 60  }
  0x15   : > { %s165_s26 = scalar_select %p164_p10, %s1594_s16, 1 }
  0x17   : > { %s1339_s27 = sshll.u32 %s165_s26, 6 }
  0x18   : > { %s168_s30 = scalar_lea.vmem %s1755_s0, %s1339_s27  ;;  %s1546_s27 = smov 48  }
  0x19   : > { %v169_v1 = vld [vmem:[%s168_s30] sm:$0xff]  ;;  %v170_v2 = vld [vmem:[%s168_s30 + $0x8] sm:$0xff]  ;;  %v171_v4 = vld [vmem:[%s168_s30 + $0x10] sm:$0xff] }
  0x1a   : > { %1368 = vmatprep.subr.mxu0 %v169_v1  ;;  %1373 = vmatprep.subr.mxu1 %v170_v2  ;;  %v172_v5 = vld [vmem:[%s168_s30 + $0x18] sm:$0xff]  ;;  %v173_v6 = vld [vmem:[%s168_s30 + $0x20] sm:$0xff]  ;;  %v174_v7 = vld [vmem:[%s168_s30 + $0x28] sm:$0xff] }
  0x1b   : > { %1369 = vmatpush3.msra.mxu0 %v169_v1  ;;  %1374 = vmatpush3.msra.mxu1 %v170_v2  ;;  %v175_v8 = vld [vmem:[%s168_s30 + $0x30] sm:$0xff]  ;;  %v176_v9 = vld [vmem:[%s168_s30 + $0x38] sm:$0xff]  ;;  %s1549_s30 = smov 52  }
  0x1c   : > { %1371 = vmatmul.mubr.msk.f32.vlgmr.msra.gmra.mrb[0].mxu0 %vm179_vm0, %v178_v3  ;;  %1376 = vmatmul.mubr.msk.f32.vlgmr.msra.gmra.mrb[0].mxu1 %vm179_vm0, %v178_v3 }
  0x1d   : > { %1378 = vmatprep.subr.mxu0 %v171_v4  ;;  %1383 = vmatprep.subr.mxu1 %v172_v5 }
  0x1e   : > { %1379 = vmatpush3.msra.mxu0 %v171_v4  ;;  %1380 = vmatprep.mubr.msk.f32.mxu0 %vm179_vm0, %v177_v0 }
  0x1f   : > { %1384 = vmatpush3.msra.mxu1 %v172_v5  ;;  %1385 = vmatprep.mubr.msk.f32.mxu1 %vm179_vm0, %v177_v0 }
  0x20   : > { %1381 = vmatmul.mubr.msk.f32.vlgmr.msra.gmra.mrb[2].mxu0 %vm179_vm0, %v178_v3  ;;  %1386 = vmatmul.mubr.msk.f32.vlgmr.msra.gmra.mrb[2].mxu1 %vm179_vm0, %v178_v3 }
  0x21   : > { %1388 = vmatprep.subr.mxu0 %v173_v6  ;;  %1393 = vmatprep.subr.mxu1 %v174_v7 }
  0x22   : > { %1389 = vmatpush3.msra.mxu0 %v173_v6  ;;  %1390 = vmatprep.mubr.msk.f32.mxu0 %vm179_vm0, %v177_v0 }
  0x23   : > { %1394 = vmatpush3.msra.mxu1 %v174_v7  ;;  %1395 = vmatprep.mubr.msk.f32.mxu1 %vm179_vm0, %v177_v0 }
  0x24   : > { %1391 = vmatmul.mubr.msk.f32.vlgmr.msra.gmra.mrb[4].mxu0 %vm179_vm0, %v178_v3  ;;  %1396 = vmatmul.mubr.msk.f32.vlgmr.msra.gmra.mrb[4].mxu1 %vm179_vm0, %v178_v3 }
  0x25   : > { %1398 = vmatprep.subr.mxu0 %v175_v8  ;;  %1403 = vmatprep.subr.mxu1 %v176_v9 }
  0x26   : > { %1399 = vmatpush3.msra.mxu0 %v175_v8  ;;  %1400 = vmatprep.mubr.msk.f32.mxu0 %vm179_vm0, %v177_v0 }
  0x27   : > { %1404 = vmatpush3.msra.mxu1 %v176_v9  ;;  %1405 = vmatprep.mubr.msk.f32.mxu1 %vm179_vm0, %v177_v0 }
  0x28   : > { %1401 = vmatmul.mubr.msk.f32.vlgmr.msra.gmra.mrb[6].mxu0 %vm179_vm0, %v178_v3  ;;  %1406 = vmatmul.mubr.msk.f32.vlgmr.msra.gmra.mrb[6].mxu1 %vm179_vm0, %v178_v3 }
  0xef   : > { %v1372_v17 = vpop.f32.mrb[0].mxu0  ;;  %v1377_v18 = vpop.f32.mrb[0].mxu1 }
  0xf0   : > { %v252_v20 = vpop.f32.mrb[1].mxu0  ;;  %v327_v21 = vpop.f32.mrb[1].mxu1 }
  0xf3   : > { %v1382_v23 = vpop.f32.mrb[2].mxu0  ;;  %v1387_v24 = vpop.f32.mrb[2].mxu1 }
  0xf4   : > { %v922_v26 = vcombine.low %v1372_v17, %v1382_v23  ;;  %v923_v27 = vcombine.high %v1372_v17, %v1382_v23  ;;  %v938_v28 = vcombine.low %v1377_v18, %v1387_v24  ;;  %v939_v29 = vcombine.high %v1377_v18, %v1387_v24  ;;  %v402_v30 = vpop.f32.mrb[3].mxu0  ;;  %v477_v31 = vpop.f32.mrb[3].mxu1 }
  0xf5   : > { %v786_v32 = vcombine.low %v252_v20, %v402_v30  ;;  %v787_v33 = vcombine.high %v252_v20, %v402_v30  ;;  %v802_v34 = vcombine.low %v327_v21, %v477_v31  ;;  %v803_v35 = vcombine.high %v327_v21, %v477_v31 }
  0xf6   : > { %v930_v36 = vrot.slane %v922_v26, %v793_v22  ;;  %v937_v37 = vrot.slane %v923_v27, %v793_v22  ;;  %v946_v38 = vrot.slane %v938_v28, %v793_v22  ;;  %v953_v39 = vrot.slane %v939_v29, %v793_v22 }
  0xf7   : > { %v794_v40 = vrot.slane %v786_v32, %v793_v22  ;;  %v801_v41 = vrot.slane %v787_v33, %v793_v22  ;;  %v810_v42 = vrot.slane %v802_v34, %v793_v22  ;;  %v817_v43 = vrot.slane %v803_v35, %v793_v22  ;;  %v1392_v44 = vpop.f32.mrb[4].mxu0  ;;  %v1397_v45 = vpop.f32.mrb[4].mxu1 }
  0xf8   : > { %v987_v46 = vcombine.high %v930_v36, %v946_v38  ;;  %v1002_v47 = vcombine.low %v937_v37, %v953_v39  ;;  %v1003_v48 = vcombine.high %v937_v37, %v953_v39  ;;  %v552_v49 = vpop.f32.mrb[5].mxu0  ;;  %v627_v50 = vpop.f32.mrb[5].mxu1  ;;  %v986_v51 = vcombine.low %v930_v36, %v946_v38 }
  0xf9   : > { %v850_v52 = vcombine.low %v794_v40, %v810_v42  ;;  %v851_v53 = vcombine.high %v794_v40, %v810_v42  ;;  %v866_v54 = vcombine.low %v801_v41, %v817_v43  ;;  %v867_v55 = vcombine.high %v801_v41, %v817_v43 }
  0xfa   : > { %v994_v56 = vrot.slane %v986_v51, %v1648_v25  ;;  %v1652_v57 = vrot.slane %v987_v46, %v1648_v25  ;;  %v1655_v58 = vrot.slane %v1002_v47, %v1648_v25  ;;  %v1658_v59 = vrot.slane %v1003_v48, %v1648_v25 }
  0xfb   : > { %v1402_v60 = vpop.f32.mrb[6].mxu0  ;;  %v1407_v61 = vpop.f32.mrb[6].mxu1  ;;  %v1661_v62 = vrot.slane %v851_v53, %v1648_v25  ;;  %v1664_v63 = vrot.slane %v850_v52, %v1648_v25  ;;  %v1667_v0 = vrot.slane %v866_v54, %v1648_v25  ;;  %v1670_v1 = vrot.slane %v867_v55, %v1648_v25  ;;  %v1147_v52 = vld [vmem:[%s1756_s1] sm:$0xff] }
  0xfc   : > { %v954_v2 = vcombine.low %v1392_v44, %v1402_v60  ;;  %v955_v3 = vcombine.high %v1392_v44, %v1402_v60  ;;  %v970_v4 = vcombine.low %v1397_v45, %v1407_v61  ;;  %v971_v5 = vcombine.high %v1397_v45, %v1407_v61  ;;  %v702_v6 = vpop.f32.mrb[7].mxu0  ;;  %v777_v7 = vpop.f32.mrb[7].mxu1  ;;  %1410 = vmatprep.mubr.msk.f32.mxu0 %vm179_vm0, %v1147_v52 }
  0xfd   : > { %v818_v8 = vcombine.low %v552_v49, %v702_v6  ;;  %v819_v9 = vcombine.high %v552_v49, %v702_v6  ;;  %v834_v10 = vcombine.low %v627_v50, %v777_v7  ;;  %v835_v11 = vcombine.high %v627_v50, %v777_v7 }
  0xfe   : > { %v962_v12 = vrot.slane %v954_v2, %v793_v22  ;;  %v969_v13 = vrot.slane %v955_v3, %v793_v22  ;;  %v978_v14 = vrot.slane %v970_v4, %v793_v22  ;;  %v985_v15 = vrot.slane %v971_v5, %v793_v22 }
  0xff   : > { %v826_v16 = vrot.slane %v818_v8, %v793_v22  ;;  %v833_v17 = vrot.slane %v819_v9, %v793_v22  ;;  %v842_v18 = vrot.slane %v834_v10, %v793_v22  ;;  %v849_v19 = vrot.slane %v835_v11, %v793_v22 }
 0x100   : > { %v1019_v20 = vcombine.high %v962_v12, %v978_v14  ;;  %v1034_v21 = vcombine.low %v969_v13, %v985_v15  ;;  %v1035_v23 = vcombine.high %v969_v13, %v985_v15  ;;  %v1018_v24 = vcombine.low %v962_v12, %v978_v14 }
 0x101   : > { %v882_v26 = vcombine.low %v826_v16, %v842_v18  ;;  %v883_v27 = vcombine.high %v826_v16, %v842_v18  ;;  %v898_v28 = vcombine.low %v833_v17, %v849_v19  ;;  %v899_v29 = vcombine.high %v833_v17, %v849_v19  ;;  %v1148_v19 = vld [vmem:[%s1756_s1 + $0x8] sm:$0xff] }
 0x102   : > { %v1026_v30 = vrot.slane %v1018_v24, %v1648_v25  ;;  %v1033_v31 = vrot.slane %v1019_v20, %v1648_v25  ;;  %v1042_v32 = vrot.slane %v1034_v21, %v1648_v25  ;;  %v1049_v33 = vrot.slane %v1035_v23, %v1648_v25 }
 0x103   : > { %v897_v34 = vrot.slane %v883_v27, %v1648_v25  ;;  %v890_v22 = vrot.slane %v882_v26, %v1648_v25  ;;  %v906_v35 = vrot.slane %v898_v28, %v1648_v25  ;;  %v913_v36 = vrot.slane %v899_v29, %v1648_v25 }
 0x104   : > { %v1051_v37 = vcombine.high %v994_v56, %v1026_v30  ;;  %v1050_v38 = vcombine.low %v994_v56, %v1026_v30  ;;  %v1053_v39 = vcombine.high %v1652_v57, %v1033_v31  ;;  %v1052_v40 = vcombine.low %v1652_v57, %v1033_v31 }
 0x105   : > { %v917_v41 = vcombine.high %v1661_v62, %v897_v34  ;;  %v915_v42 = vcombine.high %v1664_v63, %v890_v22  ;;  %v918_v43 = vcombine.low %v1667_v0, %v906_v35  ;;  %v916_v44 = vcombine.low %v1661_v62, %v897_v34 }
 0x106   : > { %1091 = vrot.lane.b32.xlu0 %v1051_v37, %s1536_s6  ;;  %1087 = vrot.lane.b32.xlu1 %v1050_v38, %s1537_s7  ;;  %v920_v25 = vcombine.low %v1670_v1, %v913_v36  ;;  %v919_v45 = vcombine.high %v1667_v0, %v906_v35  ;;  %v1054_v46 = vcombine.low %v1655_v58, %v1042_v32  ;;  %s161_s7 = sand.u32 1, %s1524_s13  }
 0x107   : > { %v921_v47 = vcombine.high %v1670_v1, %v913_v36  ;;  %v1056_v48 = vcombine.low %v1658_v59, %v1049_v33  ;;  %v1055_v49 = vcombine.high %v1655_v58, %v1042_v32  ;;  %v1057_v50 = vcombine.high %v1658_v59, %v1049_v33  ;;  %s1713_s25 = scalar_lea.sflag [#allocation3], %s161_s7 }
 0x108   : > { %v914_v51 = vcombine.low %v1664_v63, %v890_v22 }
 0x10a   : > { %1099 = vrot.lane.b32.xlu0 %v1053_v39, %s1538_s8  ;;  %1095 = vrot.lane.b32.xlu1 %v1052_v40, %s1539_s9  ;;  %s1313_s8 = sshll.u32 %s161_s7, 4 }
 0x10b   : > { %s163_s9 = scalar_lea.vmem [#allocation2], %s1313_s8 }
 0x10e   : > { %1067 = vrot.lane.b32.xlu1 %v917_v41, %s1540_s10  ;;  %1059 = vrot.lane.b32.xlu0 %v915_v42, %s1541_s11  ;;  %s1247_s10 = sshll.u32 %s163_s9, 4  ;;  %s1340_s11 = sshll.u32 %s1594_s16, 8  ;;  %s1706_s10 = int_to_ptr.vmem [resolvable:$true] %s1247_s10 }
 0x10f   : > { %s1470_s26 = scalar_lea.vmem %s1706_s10, 256  ;;  %s1551_s16 = smov [#allocation2]  }
 0x110   : > { %p1471_p11 = scmp.ne.s32.totalorder %s1706_s10, %s1470_s26 }
 0x112   : > { %1071 = vrot.lane.b32.xlu1 %v918_v43, %s1542_s17  ;;  %1063 = vrot.lane.b32.xlu0 %v916_v44, %s1543_s19  ;;  %p1472_p12 = pnand %p1471_p11, %p1611_p5 }
 0x114   : > { %p1473_p13 = pneg %p1472_p12 }
 0x116   : > { %1079 = vrot.lane.b32.xlu1 %v920_v25, %s1544_s20  ;;  %1075 = vrot.lane.b32.xlu0 %v919_v45, %s1545_s24  ;;  %s1711_s24 = scalar_lea.hbm %s1758_s3, %s1340_s11 }
 0x11a   : > { %1103 = vrot.lane.b32.xlu1 %v1054_v46, %s1546_s27  ;;  %1083 = vrot.lane.b32.xlu0 %v921_v47, %s1547_s28  ;;  %s1474_s27 = sshll.u32 %s1551_s16, 4  ;;  %s1475_s27 = int_to_ptr.vmem [resolvable:$false] %s1474_s27 }
 0x11b   : > { %s1476_s28 = scalar_lea.vmem %s1475_s27, 512  ;;  %p1477_p0 = scmp.lt.s32.totalorder %s1706_s10, %s1475_s27 }
 0x11c   : > { %p1478_p1 = scmp.lt.s32.totalorder %s1476_s28, %s1470_s26 }
 0x11e   : > { %1111 = vrot.lane.b32.xlu1 %v1056_v48, %s1548_s29  ;;  %1107 = vrot.lane.b32.xlu0 %v1055_v49, %s1549_s30  ;;  %p1479_p2 = por %p1478_p1, %p1477_p0 }
 0x120   : > { %p1480_p3 = pnand %p1479_p2, %p1473_p13 }
 0x122   : > { %1115 = vrot.lane.b32.xlu0 %v1057_v50, %s1550_s4 }
 0x178   : > { %v1092_v53 = vpop.permute.xlu0 %1091  ;;  %v1088_v54 = vpop.permute.xlu1 %1087 }
 0x17c   : > { %v1100_v55 = vpop.permute.xlu0 %1099  ;;  %v1096_v56 = vpop.permute.xlu1 %1095 }
 0x180   : > { %v1068_v57 = vpop.permute.xlu1 %1067  ;;  %v1060_v58 = vpop.permute.xlu0 %1059 }
 0x181   : > { %v1119_v59 = vsel %vm1118_vm1, %v914_v51, %v1060_v58 }
 0x184   : > { %v1072_v60 = vpop.permute.xlu1 %1071  ;;  %v1064_v61 = vpop.permute.xlu0 %1063 }
 0x185   : > { %v1120_v62 = vsel %vm179_vm0, %v1119_v59, %v1064_v61 }
 0x186   : > { %v1122_v63 = vsel %vm1121_vm2, %v1120_v62, %v1068_v57 }
 0x187   : > { %v1124_v0 = vsel %vm1123_vm3, %v1122_v63, %v1072_v60 }
 0x188   : > { %v1080_v1 = vpop.permute.xlu1 %1079  ;;  %v1076_v2 = vpop.permute.xlu0 %1075 }
 0x189   : > { %v1126_v3 = vsel %vm1125_vm4, %v1124_v0, %v1076_v2 }
 0x18a   : > { %v1128_v5 = vsel %vm1127_vm5, %v1126_v3, %v1080_v1 }
 0x18c   : > { %v1084_v4 = vpop.permute.xlu0 %1083  ;;  %v1104_v6 = vpop.permute.xlu1 %1103 }
 0x18d   : > { %v1130_v7 = vsel %vm1129_vm6, %v1128_v5, %v1084_v4 }
 0x18e   : > { %v1132_v8 = vsel %vm1131_vm7, %v1130_v7, %v1088_v54 }
 0x18f   : > { %v1134_v9 = vsel %vm1133_vm8, %v1132_v8, %v1092_v53 }
 0x190   : > { %v1108_v10 = vpop.permute.xlu0 %1107  ;;  %v1136_v11 = vsel %vm1135_vm9, %v1134_v9, %v1096_v56  ;;  %v1112_v14 = vpop.permute.xlu1 %1111 }
 0x191   : > { %v1138_v12 = vsel %vm1137_vm10, %v1136_v11, %v1100_v55 }
 0x192   : > { %v1140_v13 = vsel %vm1139_vm11, %v1138_v12, %v1104_v6 }
 0x193   : > { %v1142_v15 = vsel %vm1141_vm12, %v1140_v13, %v1108_v10 }
 0x194   : > { %v1116_v16 = vpop.permute.xlu0 %1115  ;;  %v1144_v17 = vsel %vm1143_vm13, %v1142_v15, %v1112_v14 }
 0x195   : > { %v1146_v18 = vsel %vm1145_vm14, %v1144_v17, %v1116_v16 }
 0x196   : > { %1408 = vmatprep.subr.mxu0 %v1146_v18 }
 0x197   : > { %1409 = vmatpush3.msra.mxu0 %v1146_v18 }
 0x198   : > { %1411 = vmatmul.mubr.msk.f32.vlgmr.msra.gmra.mrb[8].mxu0 %vm179_vm0, %v1148_v19 }
 0x26b   : > { %v1412_v20 = vpop.f32.mrb[8].mxu0 }
 0x26c   : > { %1232 = vst.msk [vmem:[%s163_s9 + $0x8] sm:$0xff] %vm1230_vm15, %v1412_v20  ;;  %v1221_v21 = vpop.f32.mrb[9].mxu0 }
 0x26d   : > { %1231 = vst.msk [vmem:[%s163_s9] sm:$0xff] %vm1230_vm15, %v1221_v21 }
 0x26e   : > { %1483 = shalt.err (!%p1480_p3)
}
 0x26f   : > { %s1484_s29 = scalar_lea.hbm %s1711_s24, 256  ;;  %s1488_s5 = scalar_lea.hbm %s1758_s3, 512 }
 0x270   : > { %p1485_p4 = scmp.ne.s32.totalorder %s1711_s24, %s1484_s29  ;;  %p1489_p9 = scmp.lt.u32.totalorder %s1711_s24, %s1758_s3 }
 0x271   : > { %p1490_p10 = scmp.lt.u32.totalorder %s1488_s5, %s1484_s29  ;;  %p1492_p12 = scmp.lt.u32.totalorder %s1484_s29, %s1711_s24 }
 0x272   : > { %p1486_p7 = pnand %p1485_p4, %p1611_p5 }
 0x273   : > { %p1491_p11 = por %p1490_p10, %p1489_p9 }
 0x274   : > { %p1487_p8 = pneg %p1486_p7 }
 0x275   : > { %p1493_p13 = por %p1492_p12, %p1491_p11 }
 0x277   : > { %p1494_p0 = pnand %p1493_p13, %p1487_p8 }
 0x279   : > { %1497 = shalt.err (!%p1494_p0)
}
 0x27a   : > { %s1552_s8 = smov 128  }
 0x27b   : > { %1413 = dma.vmem_to_hbm [thread:$0]  (%p1611_p5), %s1706_s10, 256, %s1711_s24, %s1713_s25, %s1552_s8, %s1552_s8, %s1543_s19  }
 0x27c PF: > { %p1419_p1 = scmp.ge.s32.totalorder %s1532_s15, 2  ;;  %s1262_s9 = sand.u32 1, %s1520_s12  }
 0x27d   : > { %s1263_s11 = scalar_lea.sflag [#allocation3], %s1262_s9 }
 0x27e   : > { %p1416_p2 = pnand %p1419_p1, %p1615_p6 }
 0x280   : > { %1515 = dma.done.wait (!%p1416_p2), %s1263_s11, 256  }
 0x281   : > { %1517 = vsyncadd (!%p1416_p2), %s1263_s11, 4294967040  ;;  %p13_p3 = scmp.ge.s32.totalorder %s1598_s18, 4   ;;  %s1761_s12 = smov %s1524_s13 }
 0x282   : > { %s1762_s13 = smov %s1528_s14  ;;  %s1763_s14 = smov %s1609_s21 }
 0x283   : > { %s1764_s15 = smov %s1598_s18  ;;  %15 = sbr.rel (!%p13_p3) target bundleno = 3 (0x3), region = 67 }
 0x28a   :  { %1268 = vsyncpa [#allocation3], 1 }
 0x28b   :  { %1270 = vsyncpa [#allocation3 + $0x1], 1 }

</bundles_post_ra>
